<compile_context>
chip_gen: v7x
topology: tpu7x:2x2x1
jax: 0.10.0
libtpu: 0.0.40
codegen_flags: <defaults>
</compile_context>

<pallas_src>
import math
import functools

import jax
import jax.numpy as jnp
from jax.experimental import pallas as pl
from jax.experimental.pallas import tpu as pltpu

_MiB = 1024 * 1024


def _round_up(v, m):
    return ((v + m - 1) // m) * m


def _lora_kernel(x_ref, a_ref, b_ref, o_ref, xa_ref, *, scaling, xa_cast_dtype):
    # x_ref : (tm, in_features)   activation tile (fetched once per M tile)
    # a_ref : (in_features, r)    pre-transposed lora_A (tiny, resident)
    # b_ref : (r, tn)             pre-transposed lora_B tile (lane-dense)
    # o_ref : (tm, tn)            output tile (lane-dense)
    # xa_ref: (tm, r) f32 scratch, persists across the j grid axis.
    @pl.when(pl.program_id(1) == 0)
    def _():
        xa = jnp.dot(x_ref[...], a_ref[...], preferred_element_type=jnp.float32)
        # Scale the tiny (tm, r) intermediate instead of the (tm, tn) output.
        xa_ref[...] = xa * scaling

    xa = xa_ref[...]
    if xa_cast_dtype is not None:
        # Keep the big matmul on the fast (bf16/narrow) MXU path.
        xa = xa.astype(xa_cast_dtype)
    y = jnp.dot(xa, b_ref[...], preferred_element_type=jnp.float32)
    o_ref[...] = y.astype(o_ref.dtype)


def _vmem_capacity_bytes():
    try:
        return int(pltpu.get_tpu_info().vmem_capacity_bytes)
    except Exception:
        return 64 * _MiB  # conservative (v7x-sized) fallback


def lora_low_rank_linear(x, lora_A, lora_B, lora_alpha, *, tm=512, tn=2048):
    """y = x @ lora_A.T @ lora_B.T * (lora_alpha / r) via a Pallas TPU kernel."""
    r, in_features = lora_A.shape
    out_features, r2 = lora_B.shape
    assert r == r2 and r > 0
    scaling = float(lora_alpha) / float(r)

    orig_shape = x.shape
    assert orig_shape[-1] == in_features
    M = 1
    for d in orig_shape[:-1]:
        M *= d
    x2d = x.reshape(M, in_features)

    # One-time transposes outside the kernel: lane-dense MXU RHS operands.
    a_t = jnp.asarray(lora_A).T  # (in_features, r)
    b_t = jnp.asarray(lora_B).T  # (r, out_features)

    x_bytes = jnp.dtype(x.dtype).itemsize
    w_bytes = jnp.dtype(b_t.dtype).itemsize
    o_bytes = x_bytes

    # ---- Generation-aware VMEM budget / megacore handling -------------------
    vmem_cap = _vmem_capacity_bytes()
    small_vmem = vmem_cap <= 64 * _MiB          # v7x-class: 64 MiB / TC, 2 TCs
    vmem_budget = min(int(0.75 * vmem_cap), vmem_cap - 16 * _MiB)  # 48 / 96 MiB
    force_m_split = small_vmem                  # feed both v7x TensorCores

    # ---- N tile: pad out_features to a multiple of 128 (lane-dense stores) --
    tn = max(128, (tn // 128) * 128)
    out_pad128 = _round_up(out_features, 128)
    tn_eff = min(tn, out_pad128)
    n_n = pl.cdiv(out_pad128, tn_eff)
    out_padded = n_n * tn_eff
    if out_padded != out_features:
        b_t = jnp.pad(b_t, ((0, 0), (0, out_padded - out_features)))

    # ---- M tile: multiple of the sublane pack, capped by VMEM ---------------
    sub = 8 * max(1, 4 // max(1, x_bytes))      # 8 for f32, 16 for bf16, ...
    tm_eff = min(tm, _round_up(M, sub))
    if force_m_split and M > sub and pl.cdiv(M, tm_eff) < 2:
        tm_eff = _round_up(pl.cdiv(M, 2), sub)
    tm_eff = _round_up(max(tm_eff, sub), sub)

    def vmem_bytes(tm_v, tn_v):
        return (2 * tm_v * in_features * x_bytes   # x tiles (double-buffered)
                + 2 * tm_v * tn_v * o_bytes        # output tiles
                + 2 * in_features * r * w_bytes    # A
                + 2 * r * tn_v * w_bytes           # B tiles
                + tm_v * r * 4)                    # xa f32 scratch

    # TODO(synk): for in_features so large that a (sub, in_features) tile still
    # overflows VMEM, a K-tiled inner pipeline over in_features would be needed;
    # here we only shrink tm.
    while tm_eff > sub and vmem_bytes(tm_eff, tn_eff) > vmem_budget:
        tm_eff = _round_up(max(tm_eff // 2, sub), sub)

    # Pad rows so the M grid divides evenly (keeps every block aligned).
    M_pad = _round_up(M, tm_eff)
    if M_pad != M:
        x2d = jnp.pad(x2d, ((0, M_pad - M), (0, 0)))
    n_m = M_pad // tm_eff

    xa_cast_dtype = None
    if jnp.dtype(b_t.dtype) != jnp.dtype(jnp.float32):
        xa_cast_dtype = b_t.dtype

    kernel = functools.partial(
        _lora_kernel, scaling=scaling, xa_cast_dtype=xa_cast_dtype)

    cost = pl.CostEstimate(
        flops=2 * M_pad * r * in_features + 2 * M_pad * r * out_padded,
        transcendentals=0,
        bytes_accessed=(M_pad * in_features * x_bytes
                        + M_pad * out_padded * o_bytes
                        + in_features * r * w_bytes
                        + r * out_padded * w_bytes),
    )

    working = vmem_bytes(tm_eff, tn_eff)
    vmem_limit = int(min(max(vmem_cap - 8 * _MiB, 32 * _MiB),
                         max(int(1.5 * working), 32 * _MiB)))

    out2d = pl.pallas_call(
        kernel,
        out_shape=jax.ShapeDtypeStruct((M_pad, out_padded), x.dtype),
        grid_spec=pltpu.PrefetchScalarGridSpec(
            num_scalar_prefetch=0,
            grid=(n_m, n_n),
            in_specs=[
                pl.BlockSpec((tm_eff, in_features), lambda i, j: (i, 0)),
                pl.BlockSpec((in_features, r), lambda i, j: (0, 0)),
                pl.BlockSpec((r, tn_eff), lambda i, j: (0, j)),
            ],
            out_specs=pl.BlockSpec((tm_eff, tn_eff), lambda i, j: (i, j)),
            scratch_shapes=[pltpu.VMEM((tm_eff, r), jnp.float32)],
        ),
        compiler_params=pltpu.CompilerParams(
            # i: independent M tiles (megacore-shardable); j: must stay
            # sequential per core so the cached xa scratch is reused.
            dimension_semantics=("parallel", "arbitrary"),
            vmem_limit_bytes=vmem_limit,
        ),
        cost_estimate=cost,
    )(x2d, a_t, b_t)

    if M_pad != M or out_padded != out_features:
        out2d = out2d[:M, :out_features]
    return out2d.reshape(*orig_shape[:-1], out_features)


if __name__ == "__main__":
    # Small shapes consistent with the module: x is [batch, seq, hidden].
    batch, seq = 2, 8
    in_features, out_features, r, lora_alpha = 32, 32, 8, 16

    key = jax.random.PRNGKey(0)
    kx, ka, kb = jax.random.split(key, 3)

    x = jax.random.normal(kx, (batch, seq, in_features), dtype=jnp.float32)

    # Deterministic parameter init.
    # lora_A: kaiming_uniform_(a=sqrt(5)) => U(-bound, bound), bound = 1/sqrt(in_features)
    bound_a = 1.0 / math.sqrt(in_features)
    lora_A = jax.random.uniform(
        ka, (r, in_features), dtype=jnp.float32, minval=-bound_a, maxval=bound_a
    )
    # PyTorch zeros lora_B (delta starts as a no-op); use a small deterministic
    # random init here so the kernel computes a non-trivial result.
    lora_B = 0.02 * jax.random.normal(kb, (out_features, r), dtype=jnp.float32)

    # TODO(synk): lora_dropout with p > 0 (stateful RNG dropout) is not
    # implemented; the module default p=0.0 is an identity and is honored.

    y = lora_low_rank_linear(x, lora_A, lora_B, lora_alpha)
    y = jax.block_until_ready(y)

    # Reference in plain JAX (same semantics as the PyTorch forward, dropout=0).
    scaling = lora_alpha / r
    y_ref = (x @ lora_A.T @ lora_B.T) * scaling
    assert y.shape == (batch, seq, out_features)
    assert jnp.allclose(y, y_ref, atol=1e-5, rtol=1e-5)

    print("KERNEL_OK")
</pallas_src>

<mosaic_0001>
module attributes {stable_mosaic.version = 11 : i64} {
  func.func @_lora_kernel(%arg0: i32, %arg1: i32, %arg2: memref<8x32xf32, #tpu.memory_space<vmem>>, %arg3: memref<32x8xf32, #tpu.memory_space<vmem>>, %arg4: memref<8x128xf32, #tpu.memory_space<vmem>>, %arg5: memref<8x128xf32, #tpu.memory_space<vmem>>, %arg6: memref<8x8xf32, #tpu.memory_space<vmem>>) attributes {dimension_semantics = [#tpu.dimension_semantics<parallel>, #tpu.dimension_semantics<arbitrary>], iteration_bounds = array<i64: 2, 1>, scalar_prefetch = 0 : i64, scratch_operands = 1 : i64, tpu.core_type = #tpu.core_type<tc>, window_params = [{transform_indices = @transform_0, window_bounds = array<i64: 8, 32>}, {pipeline_mode = #tpu.pipeline_mode<synchronous>, transform_indices = @transform_1, window_bounds = array<i64: 32, 8>}, {transform_indices = @transform_2, window_bounds = array<i64: 8, 128>}, {transform_indices = @transform_3, window_bounds = array<i64: 8, 128>}]} {
    %c0_i32 = arith.constant 0 : i32
    %0 = arith.cmpi eq, %arg1, %c0_i32 : i32
    %1 = arith.extui %0 : i1 to i32
    %c0_i32_0 = arith.constant 0 : i32
    %2 = arith.cmpi ne, %1, %c0_i32_0 : i32
    scf.if %2 {
      %c0_6 = arith.constant 0 : index
      %c0_7 = arith.constant 0 : index
      %7 = vector.load %arg2[%c0_6, %c0_7] : memref<8x32xf32, #tpu.memory_space<vmem>>, vector<8x32xf32>
      %c0_8 = arith.constant 0 : index
      %c0_9 = arith.constant 0 : index
      %8 = vector.load %arg3[%c0_8, %c0_9] : memref<32x8xf32, #tpu.memory_space<vmem>>, vector<32x8xf32>
      %cst_10 = arith.constant dense<0.000000e+00> : vector<8x8xf32>
      %9 = tpu.matmul %7, %8, %cst_10 {dimension_numbers = #tpu.dot_dimension_numbers<[1], [0], [0], [1], [0, 0, 1, 1], [], []>} : vector<8x32xf32>, vector<32x8xf32>, vector<8x8xf32> -> vector<8x8xf32>
      %cst_11 = arith.constant 2.000000e+00 : f32
      %10 = vector.broadcast %cst_11 : f32 to vector<8x8xf32>
      %11 = arith.mulf %9, %10 : vector<8x8xf32>
      %c0_12 = arith.constant 0 : index
      %c0_13 = arith.constant 0 : index
      %12 = vector.load %arg6[%c0_12, %c0_13] : memref<8x8xf32, #tpu.memory_space<vmem>>, vector<8x8xf32>
      tpu.vector_store %arg6[%c0_12, %c0_13], %11 {strides = array<i32>} : memref<8x8xf32, #tpu.memory_space<vmem>>, vector<8x8xf32>,
    } else {
    }
    %c0 = arith.constant 0 : index
    %c0_1 = arith.constant 0 : index
    %3 = vector.load %arg6[%c0, %c0_1] : memref<8x8xf32, #tpu.memory_space<vmem>>, vector<8x8xf32>
    %c0_2 = arith.constant 0 : index
    %c0_3 = arith.constant 0 : index
    %4 = vector.load %arg4[%c0_2, %c0_3] : memref<8x128xf32, #tpu.memory_space<vmem>>, vector<8x128xf32>
    %cst = arith.constant dense<0.000000e+00> : vector<8x128xf32>
    %5 = tpu.matmul %3, %4, %cst {dimension_numbers = #tpu.dot_dimension_numbers<[1], [0], [0], [1], [0, 0, 1, 1], [], []>} : vector<8x8xf32>, vector<8x128xf32>, vector<8x128xf32> -> vector<8x128xf32>
    %c0_4 = arith.constant 0 : index
    %c0_5 = arith.constant 0 : index
    %6 = vector.load %arg5[%c0_4, %c0_5] : memref<8x128xf32, #tpu.memory_space<vmem>>, vector<8x128xf32>
    tpu.vector_store %arg5[%c0_4, %c0_5], %5 {strides = array<i32>} : memref<8x128xf32, #tpu.memory_space<vmem>>, vector<8x128xf32>,
    return
  }
  func.func @transform_0(%arg0: i32, %arg1: i32) -> (i32, i32) {
    %c0_i32 = arith.constant 0 : i32
    %c0_i32_0 = arith.constant 0 : i32
    return %arg0, %c0_i32 : i32, i32
  }
  func.func @transform_1(%arg0: i32, %arg1: i32) -> (i32, i32) {
    %c0_i32 = arith.constant 0 : i32
    %c0_i32_0 = arith.constant 0 : i32
    %c0_i32_1 = arith.constant 0 : i32
    return %c0_i32, %c0_i32_0 : i32, i32
  }
  func.func @transform_2(%arg0: i32, %arg1: i32) -> (i32, i32) {
    %c0_i32 = arith.constant 0 : i32
    %c0_i32_0 = arith.constant 0 : i32
    return %c0_i32, %arg1 : i32, i32
  }
  func.func @transform_3(%arg0: i32, %arg1: i32) -> (i32, i32) {
    %c0_i32 = arith.constant 0 : i32
    return %arg0, %arg1 : i32, i32
  }
}

</mosaic_0001>

<bundles_post_ra>
// kernel: tpu_custom_call.1
= control target key start
LH: loop header
LB: loop body
LE: loop exit
PB: predicated region body
PF: predicated region fallthrough
CT: control target
= control target key end

     0   :  { %8 = vsyncpa [#allocation4], 0  ;;  %s790_s0 = inlined_call_operand.vmem [shape: f32[16,32], index: 0, kind: input, shape index: {}]   ;;  %s791_s1 = inlined_call_operand.vmem [shape: f32[32,8], index: 1, kind: input, shape index: {}]   ;;  %s792_s2 = inlined_call_operand.vmem [shape: f32[8,128], index: 2, kind: input, shape index: {}]   ;;  %s793_s3 = inlined_call_operand.hbm [shape: f32[16,128], index: 3, kind: output, shape index: {}]  }
   0x1   :  { %10 = vsyncpa [#allocation4 + $0x1], 0  ;;  %s663_s12 = smov 0   ;;  %s665_s13 = smov 0  }
   0x2   :  { %s667_s14 = smov 0   ;;  %s669_s15 = smov 0  }
   0x3   :  { %s671_s16 = smov 0   ;;  %s673_s17 = smov 0  }
   0x4 LB: > { %s458_s18 = sadd.s32 4294967295, %s637_s17   ;;  %s459_s19 = sadd.s32 4294967294, %s637_s17   ;;  %s637_s17 = sphi %s673_s17, %s16_s17   ;;  %s633_s16 = sphi %s671_s16, %s800_s16   ;;  %s629_s15 = sphi %s669_s15, %s799_s15   ;;  %s625_s14 = sphi %s667_s14, %s798_s14   ;;  %s621_s13 = sphi %s665_s13, %s797_s13   ;;  %s617_s12 = sphi %s663_s12, %s796_s12  }
   0x5   : > { %s28_s20 = sadd.s32 1, %s633_s16  ;;  %s110_s21 = sadd.s32 1, %s625_s14 }
   0x6   : > { %p30_p0 = scmp.ge.s32.totalorder %s28_s20, 2  ;;  %p120_p1 = scmp.ne.s32.totalorder %s625_s14, %s621_s13 }
   0x7   : > { %p121_p2 = scmp.eq.s32.totalorder %s458_s18, 1  ;;  %p126_p3 = scmp.ne.s32.totalorder %s621_s13, %s617_s12 }
   0x8   : > { %s802_s20 = smov (%p30_p0, %s28_s20), 0  ;;  %p127_p5 = scmp.eq.s32.totalorder %s459_s19, 1 }
   0x9   : > { %p703_p4 = por %p121_p2, %p120_p1  ;;  %s105_s23 = ssub.s32 %s633_s16, %s802_s20 }
   0xa   : > { %p463_p6 = scmp.ge.s32.totalorder %s637_s17, 1  ;;  %p108_p7 = scmp.eq.s32.totalorder %s105_s23, 0 }
   0xb   : > { %p710_p8 = por %p127_p5, %p126_p3  ;;  %p162_p9 = scmp.lt.s32.totalorder %s637_s17, 3 }
   0xc   : > { %s716_s25 = scalar_select %p108_p7, %s625_s14, %s110_s21  }
   0xd   : > { %p163_p10 = pnand %p463_p6, %p162_p9 }
   0xe   : > { %v202_v0 = vld [vmem:[%s791_s1] sm:$0xff] (!%p163_p10)  ;;  %v203_v1 = vld [vmem:[%s791_s1 + $0x8] sm:$0xff] (!%p163_p10)  ;;  %v204_v2 = vld [vmem:[%s791_s1 + $0x10] sm:$0xff] (!%p163_p10)  ;;  %v639_v3 = vmov (!%p163_p10), 0.0|0.0   ;;  %vm640_vm0 = vmmov (!%p163_p10), 0   ;;  %v641_v6 = vmov (!%p163_p10), 0.0  }
   0xf   : > { %166 = sbr.rel (%p163_p10) target bundleno = 475 (0x1db), region = 32  ;;  %495 = vmatprep.subr.bf16.mxu0 (!%p163_p10), %v639_v3  ;;  %v496_v4 = vpack.c.bf16 (!%p163_p10), %v203_v1, %v202_v0  ;;  %v205_v5 = vld [vmem:[%s791_s1 + $0x18] sm:$0xff] (!%p163_p10)  ;;  %487 = vmatprep.mubr.msk.f32.mxu0 (!%p163_p10), %vm640_vm0, %v641_v6  ;;  %p189_p11 = scmp.lt.s32.totalorder (!%p163_p10), %s629_s15, 1  ;;  %vm206_vm1 = vcmask (!%p163_p10), 261120   ;;  %v284_v9 = vld [vmem:[%s792_s2] sm:$0xff] (!%p163_p10)  ;;  %vm281_vm2 = vcmask (!%p163_p10), 64512  }
  0x10   : > { %490 = vmatprep.subr.mxu1 (!%p163_p10), %v641_v6  ;;  %492 = vmatprep.mubr.msk.f32.mxu1 (!%p163_p10), %vm640_vm0, %v641_v6  ;;  %v499_v7 = vpack.c.bf16 (!%p163_p10), %v205_v5, %v204_v2  ;;  %s186_s21 = sand.u32 (!%p163_p10), 1, %s621_s13   ;;  %s469_s28 = sshll.u32 (!%p163_p10), %s629_s15, 7 }
  0x11   : > { %497 = vmatpush3.bf16.msra.mxu0 (!%p163_p10), %v496_v4  ;;  %491 = vmatpush3.msra.mxu1 (!%p163_p10), %v284_v9  ;;  %s464_s23 = sshll.u32 (!%p163_p10), %s186_s21, 3  ;;  %s745_s4 = scalar_lea.hbm (!%p163_p10), %s793_s3, %s469_s28 }
  0x12   : > { %498 = vmatprep.subr.bf16.mxu0 (!%p163_p10), %v639_v3  ;;  %s188_s26 = scalar_lea.vmem (!%p163_p10), [#allocation3], %s464_s23  ;;  %s361_s5 = scalar_lea.sflag (!%p163_p10), [#allocation4], %s186_s21 }
  0x13   : > { %s375_s27 = sshll.u32 (!%p163_p10), %s188_s26, 4  ;;  %s740_s27 = int_to_ptr.vmem [resolvable:$true] %s375_s27 }
  0x14   : > { %s559_s6 = scalar_lea.vmem (!%p163_p10), %s740_s27, 128 }
  0x15   : > { %500 = vmatpush3.bf16.msra.mxu0 (!%p163_p10), %v499_v7  ;;  %p560_p12 = scmp.ne.s32.totalorder (!%p163_p10), %s740_s27, %s559_s6 }
  0x16   : > { %s190_s7 = scalar_select %p189_p11, %s629_s15, 1 }
  0x17   : > { %p561_p13 = pnand %p560_p12, %p703_p4  ;;  %s642_s15 = smov [#allocation3]  }
  0x18   : > { %s465_s8 = sshll.u32 %s190_s7, 3  ;;  %s563_s7 = sshll.u32 %s642_s15, 4  ;;  %s564_s7 = int_to_ptr.vmem [resolvable:$false] %s563_s7 }
  0x19   : > { %s192_s11 = scalar_lea.vmem %s790_s0, %s465_s8  ;;  %p562_p0 = pneg %p561_p13 }
  0x1a   : > { %v201_v8 = vld [vmem:[%s192_s11] sm:$0xff]  ;;  %s565_s8 = scalar_lea.vmem %s564_s7, 256  ;;  %p566_p1 = scmp.lt.s32.totalorder %s740_s27, %s564_s7 }
  0x1b   : > { %488 = vmatmul.mubr.msk.f32.vlgmr.msra.gmra.mrb[0].mxu0 %vm206_vm1, %v201_v8  ;;  %p567_p2 = scmp.lt.s32.totalorder %s565_s8, %s559_s6 }
  0x1d   : > { %p568_p3 = por %p567_p2, %p566_p1 }
  0x1f   : > { %p569_p5 = pnand %p568_p3, %p562_p0 }
  0xee   : > { %v276_v10 = vpop.f32.mrb[0].mxu0 }
  0xef   : > { %v280_v11 = vmul.f32 2.0, %v276_v10  ;;  %v489_v12 = vpop.f32.mrb[1].mxu0 }
  0xf1   : > { %282 = vst.msk [vmem:[#allocation2] sm:$0xff] %vm281_vm2, %v280_v11 }
  0xf8   : > { %v283_v13 = vld [vmem:[#allocation2] sm:$0xff] }
  0xf9   : > { %493 = vmatmul.mubr.msk.f32.vlgmr.msra.gmra.mrb[0].mxu1 %vm281_vm2, %v283_v13 }
 0x1cc   : > { %v355_v14 = vpop.f32.mrb[0].mxu1 }
 0x1cd   : > { %359 = vst [vmem:[%s188_s26] sm:$0xff] %v355_v14  ;;  %v494_v15 = vpop.f32.mrb[1].mxu1 }
 0x1ce   : > { %572 = shalt.err (!%p569_p5)
}
 0x1cf   : > { %s573_s9 = scalar_lea.hbm %s745_s4, 128  ;;  %s577_s18 = scalar_lea.hbm %s793_s3, 256 }
 0x1d0   : > { %p574_p6 = scmp.ne.s32.totalorder %s745_s4, %s573_s9  ;;  %p578_p10 = scmp.lt.u32.totalorder %s745_s4, %s793_s3 }
 0x1d1   : > { %p579_p11 = scmp.lt.u32.totalorder %s577_s18, %s573_s9  ;;  %p581_p13 = scmp.lt.u32.totalorder %s573_s9, %s745_s4 }
 0x1d2   : > { %p575_p7 = pnand %p574_p6, %p703_p4 }
 0x1d3   : > { %p580_p12 = por %p579_p11, %p578_p10 }
 0x1d4   : > { %p576_p9 = pneg %p575_p7 }
 0x1d5   : > { %p582_p0 = por %p581_p13, %p580_p12 }
 0x1d7   : > { %p583_p1 = pnand %p582_p0, %p576_p9 }
 0x1d9   : > { %586 = shalt.err (!%p583_p1)
}
 0x1da   : > { %501 = dma.vmem_to_hbm [thread:$0]  (%p703_p4), %s740_s27, 128, %s745_s4, %s361_s5  }
 0x1db PF: > { %p507_p2 = scmp.ge.s32.totalorder %s637_s17, 2  ;;  %s387_s23 = sand.u32 1, %s617_s12  }
 0x1dc   : > { %s388_s26 = scalar_lea.sflag [#allocation4], %s387_s23 }
 0x1dd   : > { %p504_p3 = pnand %p507_p2, %p710_p8 }
 0x1df   : > { %612 = dma.done.wait (!%p504_p3), %s388_s26, 128  }
 0x1e0   : > { %614 = vsyncadd (!%p504_p3), %s388_s26, 4294967168  ;;  %s16_s17 = sadd.s32 1, %s637_s17   ;;  %s796_s12 = smov %s621_s13 }
 0x1e1   : > { %p13_p5 = scmp.ge.s32.totalorder %s16_s17, 4   ;;  %s797_s13 = smov %s625_s14 }
 0x1e2   : > { %s798_s14 = smov %s716_s25  ;;  %s799_s15 = smov %s633_s16 }
 0x1e3   : > { %s800_s16 = smov %s802_s20  ;;  %15 = sbr.rel (!%p13_p5) target bundleno = 4 (0x4), region = 74 }
 0x1ea   :  { %393 = vsyncpa [#allocation4], 1 }
 0x1eb   :  { %395 = vsyncpa [#allocation4 + $0x1], 1 }

</bundles_post_ra>
